<compile_context>
chip_gen: v5e
topology: v5e:2x2
jax: 0.10.0
libtpu: 0.0.40
codegen_flags: <defaults>
</compile_context>

<pallas_src>
import functools

import jax
import jax.numpy as jnp
from jax.experimental import pallas as pl
from jax.experimental.pallas import tpu as pltpu

MAX_LENGTH = 15
HIDDEN = 32        # hidden_size (== embedding dim, as required by the module's cat())
OUTPUT = 40        # output_size (target vocab)
VOCAB = 40         # source vocab for the (synthetic) "glove" embedding table
NEG_INF = -1e10


def _fused_decoder_kernel(
    tok_ref,                                   # SMEM (T,) int32 — scalar prefetch
    emb_tbl_ref,                               # (VOCAB, 1, H) VMEM, resident
    h0_ref, c0_ref,                            # (1, H) initial hidden / cell
    enc_ref,                                   # (L, H) encoder outputs, resident
    mask_bias_ref,                             # (1, L) additive mask bias (-1e10 at masked)
    slab_ref,                                  # (7H+8, 128) packed weights + biases, resident
    logp_ref, attnw_ref, hout_ref, cout_ref,   # per-step outputs: (1,1,OUT)/(1,1,L)/(1,1,H)/(1,1,H)
    h_scr, c_scr,                              # VMEM scratch (1, H): recurrent state across steps
):
    t = pl.program_id(0)
    H = h_scr.shape[-1]
    L = mask_bias_ref.shape[-1]
    OUT = logp_ref.shape[-1]

    @pl.when(t == 0)
    def _():
        h_scr[...] = h0_ref[...]
        c_scr[...] = c0_ref[...]

    # Embedding gather inside the kernel (dynamic index on the leading dim).
    # TODO(synk): dropout(p=0.1) treated as identity (eval-mode forward); training-mode
    # dropout would use pltpu.prng_seed + pltpu.prng_random_bits here.
    tok = tok_ref[t]
    emb = emb_tbl_ref[tok]                     # (1, H)
    h = h_scr[...]                             # (1, H)
    c = c_scr[...]                             # (1, H)

    # Biases live in one aligned (8, 128) tile at the bottom of the slab.
    biases = slab_ref[7 * H:7 * H + 8, :]      # (8, 128)
    b_attn = biases[0:1, 0:L]
    b_comb = biases[1:2, 0:H]
    b_ih = biases[2:3, :]
    b_hh = biases[3:4, :]
    b_out = biases[4:5, 0:OUT]

    # attn = Linear_{2H->L}(cat(emb, h)); concat avoided by splitting weight rows.
    # Mask applied as a precomputed additive bias (matches masked_fill(-1e10) after
    # softmax whenever at least one position is unmasked).
    attn = (jnp.dot(emb, slab_ref[0:H, 0:L], preferred_element_type=jnp.float32)
            + jnp.dot(h, slab_ref[H:2 * H, 0:L], preferred_element_type=jnp.float32)
            + b_attn + mask_bias_ref[...])                                  # (1, L)
    attn = attn - jnp.max(attn, axis=-1, keepdims=True)
    e = jnp.exp(attn)
    attn_w = e / jnp.sum(e, axis=-1, keepdims=True)                         # (1, L)
    attnw_ref[0] = attn_w

    # attn_applied = attn_weights @ encoder_outputs
    applied = jnp.dot(attn_w, enc_ref[...], preferred_element_type=jnp.float32)  # (1, H)

    # attn_combine(cat(emb, attn_applied)) -> relu
    x = jnp.maximum(
        jnp.dot(emb, slab_ref[2 * H:3 * H, 0:H], preferred_element_type=jnp.float32)
        + jnp.dot(applied, slab_ref[3 * H:4 * H, 0:H], preferred_element_type=jnp.float32)
        + b_comb, 0.0)                                                      # (1, H)

    # Single LSTM cell step (seq_len=1, batch=1), PyTorch gate order (i, f, g, o).
    gates = (jnp.dot(x, slab_ref[4 * H:5 * H, :], preferred_element_type=jnp.float32) + b_ih
             + jnp.dot(h, slab_ref[5 * H:6 * H, :], preferred_element_type=jnp.float32) + b_hh)
    i_g = jax.nn.sigmoid(gates[:, 0 * H:1 * H])
    f_g = jax.nn.sigmoid(gates[:, 1 * H:2 * H])
    g_g = jnp.tanh(gates[:, 2 * H:3 * H])
    o_g = jax.nn.sigmoid(gates[:, 3 * H:4 * H])
    c_new = f_g * c + i_g * g_g
    h_new = o_g * jnp.tanh(c_new)
    h_scr[...] = h_new
    c_scr[...] = c_new
    hout_ref[0] = h_new
    cout_ref[0] = c_new

    # Output projection + log_softmax.
    logits = jnp.dot(h_new, slab_ref[6 * H:7 * H, 0:OUT],
                     preferred_element_type=jnp.float32) + b_out            # (1, OUT)
    shifted = logits - jnp.max(logits, axis=-1, keepdims=True)
    logp_ref[0] = shifted - jnp.log(jnp.sum(jnp.exp(shifted), axis=-1, keepdims=True))


@functools.partial(jax.jit, static_argnames=("out_size",))
def attn_decoder_decode(packed, tokens, hidden, encoder_outputs, mask, *, out_size):
    """Run T sequential AttnDecoderRNN.forward steps in ONE pallas_call (grid over steps)."""
    h0, c0 = hidden                             # each (1, 1, H)
    H = h0.shape[-1]
    L = encoder_outputs.shape[0]
    T = tokens.shape[0]
    OUT = out_size
    slab = packed["slab"]
    emb_tbl = packed["embedding"]               # (VOCAB, 1, H)

    # Loop-invariant additive attention-mask bias, computed once per decode.
    mask_bias = jnp.where(mask.reshape(1, L) == 0,
                          jnp.float32(NEG_INF), jnp.float32(0.0))

    grid_spec = pltpu.PrefetchScalarGridSpec(
        num_scalar_prefetch=1,
        grid=(T,),
        in_specs=[
            # Constant block index -> fetched into VMEM once, resident for all steps.
            pl.BlockSpec(emb_tbl.shape, lambda t, tok: (0, 0, 0)),
            pl.BlockSpec((1, H), lambda t, tok: (0, 0)),
            pl.BlockSpec((1, H), lambda t, tok: (0, 0)),
            pl.BlockSpec((L, H), lambda t, tok: (0, 0)),
            pl.BlockSpec((1, L), lambda t, tok: (0, 0)),
            pl.BlockSpec(slab.shape, lambda t, tok: (0, 0)),
        ],
        out_specs=(
            pl.BlockSpec((1, 1, OUT), lambda t, tok: (t, 0, 0)),
            pl.BlockSpec((1, 1, L), lambda t, tok: (t, 0, 0)),
            pl.BlockSpec((1, 1, H), lambda t, tok: (t, 0, 0)),
            pl.BlockSpec((1, 1, H), lambda t, tok: (t, 0, 0)),
        ),
        scratch_shapes=[pltpu.VMEM((1, H), jnp.float32),    # h carry
                        pltpu.VMEM((1, H), jnp.float32)],   # c carry
    )

    flops = T * 2 * (2 * H * L + L * H + 2 * H * H + 2 * H * 4 * H + H * OUT)
    cost = pl.CostEstimate(
        flops=flops,
        transcendentals=T * (L + OUT + 6 * H),
        bytes_accessed=4 * (slab.size + emb_tbl.size + encoder_outputs.size
                            + T * (OUT + L + 2 * H)),
    )

    logp, attn_w, h_all, c_all = pl.pallas_call(
        _fused_decoder_kernel,
        grid_spec=grid_spec,
        out_shape=(
            jax.ShapeDtypeStruct((T, 1, OUT), jnp.float32),
            jax.ShapeDtypeStruct((T, 1, L), jnp.float32),
            jax.ShapeDtypeStruct((T, 1, H), jnp.float32),
            jax.ShapeDtypeStruct((T, 1, H), jnp.float32),
        ),
        compiler_params=pltpu.CompilerParams(
            dimension_semantics=("arbitrary",)),   # steps are sequentially dependent
        cost_estimate=cost,
    )(tokens.astype(jnp.int32),
      emb_tbl,
      h0.reshape(1, H).astype(jnp.float32),
      c0.reshape(1, H).astype(jnp.float32),
      encoder_outputs.astype(jnp.float32),
      mask_bias,
      slab)

    logp = logp.reshape(T, OUT)
    attn_w = attn_w.reshape(T, L)
    h_all = h_all.reshape(T, H)
    c_all = c_all.reshape(T, H)
    final_hidden = (h_all[-1].reshape(1, 1, H), c_all[-1].reshape(1, 1, H))
    return logp, final_hidden, attn_w, h_all, c_all


def attn_decoder_forward(packed, input_idx, hidden, encoder_outputs, mask, *, out_size=OUTPUT):
    """Single-step API matching the original module's forward() exactly (T=1 fused call)."""
    tokens = jnp.asarray(input_idx, jnp.int32).reshape(1)
    logp, new_hidden, attn_w, _, _ = attn_decoder_decode(
        packed, tokens, hidden, encoder_outputs, mask, out_size=out_size)
    return logp, new_hidden, attn_w


def pack_params(params, hidden=HIDDEN, output=OUTPUT, max_length=MAX_LENGTH):
    """Pack all weights/biases into one (7H+8, 128) f32 slab + a (VOCAB,1,H) table."""
    H, L, OUT = hidden, max_length, output
    rows = 7 * H + 8
    slab = jnp.zeros((rows, 128), jnp.float32)
    slab = slab.at[0:2 * H, 0:L].set(params["w_attn"])           # rows   0: 64
    slab = slab.at[2 * H:4 * H, 0:H].set(params["w_comb"])       # rows  64:128
    slab = slab.at[4 * H:5 * H, 0:4 * H].set(params["w_ih"])     # rows 128:160
    slab = slab.at[5 * H:6 * H, 0:4 * H].set(params["w_hh"])     # rows 160:192
    slab = slab.at[6 * H:7 * H, 0:OUT].set(params["w_out"])      # rows 192:224
    slab = slab.at[7 * H + 0, 0:L].set(params["b_attn"][0])      # biases: rows 224..228
    slab = slab.at[7 * H + 1, 0:H].set(params["b_comb"][0])
    slab = slab.at[7 * H + 2, 0:4 * H].set(params["b_ih"][0])
    slab = slab.at[7 * H + 3, 0:4 * H].set(params["b_hh"][0])
    slab = slab.at[7 * H + 4, 0:OUT].set(params["b_out"][0])
    emb_tbl = params["embedding"].astype(jnp.float32).reshape(-1, 1, H)
    return {"slab": slab, "embedding": emb_tbl}


def reference_decode(params, tokens, hidden, encoder_outputs, mask):
    """Pure-JAX reference: T sequential forward steps mirroring the PyTorch module (eval mode)."""
    h = hidden[0].reshape(1, -1)
    c = hidden[1].reshape(1, -1)
    H = h.shape[-1]
    logps, aws, hs, cs = [], [], [], []
    for tok in list(tokens):
        emb = params["embedding"][tok].reshape(1, H).astype(jnp.float32)
        cat1 = jnp.concatenate([emb, h], axis=-1)
        attn = cat1 @ params["w_attn"] + params["b_attn"]
        attn = jnp.where(mask.reshape(1, -1) == 0, jnp.float32(NEG_INF), attn)
        aw = jax.nn.softmax(attn, axis=1)
        applied = aw @ encoder_outputs
        cat2 = jnp.concatenate([emb, applied], axis=-1)
        x = jax.nn.relu(cat2 @ params["w_comb"] + params["b_comb"])
        gates = x @ params["w_ih"] + params["b_ih"] + h @ params["w_hh"] + params["b_hh"]
        i_g, f_g, g_g, o_g = jnp.split(gates, 4, axis=-1)
        c = jax.nn.sigmoid(f_g) * c + jax.nn.sigmoid(i_g) * jnp.tanh(g_g)
        h = jax.nn.sigmoid(o_g) * jnp.tanh(c)
        logp = jax.nn.log_softmax(h @ params["w_out"] + params["b_out"], axis=1)
        logps.append(logp); aws.append(aw); hs.append(h); cs.append(c)
    return (jnp.concatenate(logps, 0), jnp.concatenate(aws, 0),
            jnp.concatenate(hs, 0), jnp.concatenate(cs, 0))


def init_params(key, hidden=HIDDEN, output=OUTPUT, vocab=VOCAB, max_length=MAX_LENGTH):
    ks = jax.random.split(key, 10)
    s = 0.1
    # Synthetic "glove" embedding table (deterministic; no file load).
    return {
        "embedding": jax.random.normal(ks[0], (vocab, hidden), jnp.float32),
        "w_attn": s * jax.random.normal(ks[1], (2 * hidden, max_length), jnp.float32),
        "b_attn": s * jax.random.normal(ks[2], (1, max_length), jnp.float32),
        "w_comb": s * jax.random.normal(ks[3], (2 * hidden, hidden), jnp.float32),
        "b_comb": s * jax.random.normal(ks[4], (1, hidden), jnp.float32),
        "w_ih": s * jax.random.normal(ks[5], (hidden, 4 * hidden), jnp.float32),
        "b_ih": s * jax.random.normal(ks[6], (1, 4 * hidden), jnp.float32),
        "w_hh": s * jax.random.normal(ks[7], (hidden, 4 * hidden), jnp.float32),
        "b_hh": s * jax.random.normal(ks[8], (1, 4 * hidden), jnp.float32),
        "w_out": s * jax.random.normal(ks[9], (hidden, output), jnp.float32),
        "b_out": jnp.zeros((1, output), jnp.float32),
    }


if __name__ == "__main__":
    key = jax.random.PRNGKey(0)
    k_par, k_h, k_c, k_enc, k_tok = jax.random.split(key, 5)

    params = init_params(k_par)
    packed = pack_params(params)

    T = 6
    tokens = jax.random.randint(k_tok, (T,), 0, VOCAB, dtype=jnp.int32)
    hidden = (0.1 * jax.random.normal(k_h, (1, 1, HIDDEN), jnp.float32),
              0.1 * jax.random.normal(k_c, (1, 1, HIDDEN), jnp.float32))
    encoder_outputs = jax.random.normal(k_enc, (MAX_LENGTH, HIDDEN), jnp.float32)
    mask = (jnp.arange(MAX_LENGTH) < 10).astype(jnp.int32)     # last 5 positions masked

    # Fused multi-step decode (one pallas_call for all T steps).
    logp, (h_fin, c_fin), attn_w, h_all, c_all = attn_decoder_decode(
        packed, tokens, hidden, encoder_outputs, mask, out_size=OUTPUT)
    jax.block_until_ready((logp, h_fin, c_fin, attn_w, h_all, c_all))

    ref_logp, ref_aw, ref_h, ref_c = reference_decode(
        params, tokens, hidden, encoder_outputs, mask)

    assert jnp.allclose(logp, ref_logp, atol=2e-4), "log_softmax output mismatch"
    assert jnp.allclose(attn_w, ref_aw, atol=2e-5), "attention weights mismatch"
    assert jnp.allclose(h_all, ref_h, atol=1e-4), "hidden state mismatch"
    assert jnp.allclose(c_all, ref_c, atol=1e-4), "cell state mismatch"
    assert jnp.allclose(h_fin.reshape(1, -1), ref_h[-1:], atol=1e-4), "final hidden mismatch"
    assert jnp.allclose(c_fin.reshape(1, -1), ref_c[-1:], atol=1e-4), "final cell mismatch"

    # Single-step API parity (original module.forward semantics).
    logp1, (h1, c1), aw1 = attn_decoder_forward(
        packed, tokens[0], hidden, encoder_outputs, mask)
    jax.block_until_ready((logp1, h1, c1, aw1))
    assert jnp.allclose(logp1, ref_logp[0:1], atol=2e-4), "single-step logp mismatch"
    assert jnp.allclose(aw1, ref_aw[0:1], atol=2e-5), "single-step attn mismatch"
    assert jnp.allclose(h1.reshape(1, -1), ref_h[0:1], atol=1e-4), "single-step hidden mismatch"

    print("KERNEL_OK")
</pallas_src>

<mosaic_0001>
module attributes {stable_mosaic.version = 11 : i64} {
  func.func @_fused_decoder_kernel(%arg0: i32, %arg1: memref<6xi32, #tpu.memory_space<smem>>, %arg2: memref<40x1x32xf32, #tpu.memory_space<vmem>>, %arg3: memref<1x32xf32, #tpu.memory_space<vmem>>, %arg4: memref<1x32xf32, #tpu.memory_space<vmem>>, %arg5: memref<15x32xf32, #tpu.memory_space<vmem>>, %arg6: memref<1x15xf32, #tpu.memory_space<vmem>>, %arg7: memref<232x128xf32, #tpu.memory_space<vmem>>, %arg8: memref<1x1x40xf32, #tpu.memory_space<vmem>>, %arg9: memref<1x1x15xf32, #tpu.memory_space<vmem>>, %arg10: memref<1x1x32xf32, #tpu.memory_space<vmem>>, %arg11: memref<1x1x32xf32, #tpu.memory_space<vmem>>, %arg12: memref<1x32xf32, #tpu.memory_space<vmem>>, %arg13: memref<1x32xf32, #tpu.memory_space<vmem>>) attributes {dimension_semantics = [#tpu.dimension_semantics<arbitrary>], iteration_bounds = array<i64: 6>, scalar_prefetch = 1 : i64, scratch_operands = 2 : i64, tpu.core_type = #tpu.core_type<tc>, window_params = [{pipeline_mode = #tpu.pipeline_mode<synchronous>, transform_indices = @transform_0, window_bounds = array<i64: 40, 1, 32>}, {pipeline_mode = #tpu.pipeline_mode<synchronous>, transform_indices = @transform_1, window_bounds = array<i64: 1, 32>}, {pipeline_mode = #tpu.pipeline_mode<synchronous>, transform_indices = @transform_2, window_bounds = array<i64: 1, 32>}, {pipeline_mode = #tpu.pipeline_mode<synchronous>, transform_indices = @transform_3, window_bounds = array<i64: 15, 32>}, {pipeline_mode = #tpu.pipeline_mode<synchronous>, transform_indices = @transform_4, window_bounds = array<i64: 1, 15>}, {pipeline_mode = #tpu.pipeline_mode<synchronous>, transform_indices = @transform_5, window_bounds = array<i64: 232, 128>}, {transform_indices = @transform_6, window_bounds = array<i64: 1, 1, 40>}, {transform_indices = @transform_7, window_bounds = array<i64: 1, 1, 15>}, {transform_indices = @transform_8, window_bounds = array<i64: 1, 1, 32>}, {transform_indices = @transform_9, window_bounds = array<i64: 1, 1, 32>}]} {
    %c0_i32 = arith.constant 0 : i32
    %0 = arith.cmpi eq, %arg0, %c0_i32 : i32
    %1 = arith.extui %0 : i1 to i32
    %c0_i32_0 = arith.constant 0 : i32
    %2 = arith.cmpi ne, %1, %c0_i32_0 : i32
    scf.if %2 {
      %c0_50 = arith.constant 0 : index
      %c0_51 = arith.constant 0 : index
      %102 = vector.load %arg3[%c0_50, %c0_51] : memref<1x32xf32, #tpu.memory_space<vmem>>, vector<1x32xf32>
      %c0_52 = arith.constant 0 : index
      %c0_53 = arith.constant 0 : index
      %103 = vector.load %arg12[%c0_52, %c0_53] : memref<1x32xf32, #tpu.memory_space<vmem>>, vector<1x32xf32>
      tpu.vector_store %arg12[%c0_52, %c0_53], %102 {strides = array<i32>} : memref<1x32xf32, #tpu.memory_space<vmem>>, vector<1x32xf32>,
      %c0_54 = arith.constant 0 : index
      %c0_55 = arith.constant 0 : index
      %104 = vector.load %arg4[%c0_54, %c0_55] : memref<1x32xf32, #tpu.memory_space<vmem>>, vector<1x32xf32>
      %c0_56 = arith.constant 0 : index
      %c0_57 = arith.constant 0 : index
      %105 = vector.load %arg13[%c0_56, %c0_57] : memref<1x32xf32, #tpu.memory_space<vmem>>, vector<1x32xf32>
      tpu.vector_store %arg13[%c0_56, %c0_57], %104 {strides = array<i32>} : memref<1x32xf32, #tpu.memory_space<vmem>>, vector<1x32xf32>,
    } else {
    }
    %3 = arith.index_cast %arg0 : i32 to index
    %4 = memref.load %arg1[%3] : memref<6xi32, #tpu.memory_space<smem>>
    %5 = arith.index_cast %4 : i32 to index
    %c0 = arith.constant 0 : index
    %c0_1 = arith.constant 0 : index
    %6 = vector.load %arg2[%5, %c0, %c0_1] : memref<40x1x32xf32, #tpu.memory_space<vmem>>, vector<1x1x32xf32>
    %7 = vector.shape_cast %6 : vector<1x1x32xf32> to vector<1x32xf32>
    %c0_2 = arith.constant 0 : index
    %c0_3 = arith.constant 0 : index
    %8 = vector.load %arg12[%c0_2, %c0_3] : memref<1x32xf32, #tpu.memory_space<vmem>>, vector<1x32xf32>
    %c0_4 = arith.constant 0 : index
    %c0_5 = arith.constant 0 : index
    %9 = vector.load %arg13[%c0_4, %c0_5] : memref<1x32xf32, #tpu.memory_space<vmem>>, vector<1x32xf32>
    %c224 = arith.constant 224 : index
    %c0_6 = arith.constant 0 : index
    %10 = vector.load %arg7[%c224, %c0_6] : memref<232x128xf32, #tpu.memory_space<vmem>>, vector<8x128xf32>
    %11 = vector.extract_strided_slice %10 {offsets = [0, 0], sizes = [1, 15], strides = [1, 1]} : vector<8x128xf32> to vector<1x15xf32>
    %12 = vector.extract_strided_slice %10 {offsets = [1, 0], sizes = [1, 32], strides = [1, 1]} : vector<8x128xf32> to vector<1x32xf32>
    %13 = vector.extract_strided_slice %10 {offsets = [2, 0], sizes = [1, 128], strides = [1, 1]} : vector<8x128xf32> to vector<1x128xf32>
    %14 = vector.extract_strided_slice %10 {offsets = [3, 0], sizes = [1, 128], strides = [1, 1]} : vector<8x128xf32> to vector<1x128xf32>
    %15 = vector.extract_strided_slice %10 {offsets = [4, 0], sizes = [1, 40], strides = [1, 1]} : vector<8x128xf32> to vector<1x40xf32>
    %c0_7 = arith.constant 0 : index
    %c0_8 = arith.constant 0 : index
    %16 = vector.load %arg7[%c0_7, %c0_8] : memref<232x128xf32, #tpu.memory_space<vmem>>, vector<32x15xf32>
    %cst = arith.constant dense<0.000000e+00> : vector<1x15xf32>
    %17 = tpu.matmul %7, %16, %cst {dimension_numbers = #tpu.dot_dimension_numbers<[1], [0], [0], [1], [0, 0, 1, 1], [], []>} : vector<1x32xf32>, vector<32x15xf32>, vector<1x15xf32> -> vector<1x15xf32>
    %c32 = arith.constant 32 : index
    %c0_9 = arith.constant 0 : index
    %18 = vector.load %arg7[%c32, %c0_9] : memref<232x128xf32, #tpu.memory_space<vmem>>, vector<32x15xf32>
    %cst_10 = arith.constant dense<0.000000e+00> : vector<1x15xf32>
    %19 = tpu.matmul %8, %18, %cst_10 {dimension_numbers = #tpu.dot_dimension_numbers<[1], [0], [0], [1], [0, 0, 1, 1], [], []>} : vector<1x32xf32>, vector<32x15xf32>, vector<1x15xf32> -> vector<1x15xf32>
    %20 = arith.addf %17, %19 : vector<1x15xf32>
    %21 = arith.addf %20, %11 : vector<1x15xf32>
    %c0_11 = arith.constant 0 : index
    %c0_12 = arith.constant 0 : index
    %22 = vector.load %arg6[%c0_11, %c0_12] : memref<1x15xf32, #tpu.memory_space<vmem>>, vector<1x15xf32>
    %23 = arith.addf %21, %22 : vector<1x15xf32>
    %cst_13 = arith.constant dense<0xFF800000> : vector<1xf32>
    %24 = vector.multi_reduction <maximumf>, %23, %cst_13 [1] : vector<1x15xf32> to vector<1xf32>
    %25 = vector.shape_cast %24 : vector<1xf32> to vector<1x1xf32>
    %26 = vector.broadcast %25 : vector<1x1xf32> to vector<1x15xf32>
    %27 = arith.subf %23, %26 : vector<1x15xf32>
    %28 = math.exp %27 : vector<1x15xf32>
    %cst_14 = arith.constant dense<0.000000e+00> : vector<1xf32>
    %29 = vector.multi_reduction <add>, %28, %cst_14 [1] : vector<1x15xf32> to vector<1xf32>
    %30 = vector.shape_cast %29 : vector<1xf32> to vector<1x1xf32>
    %31 = vector.broadcast %30 : vector<1x1xf32> to vector<1x15xf32>
    %32 = arith.divf %28, %31 : vector<1x15xf32>
    %c0_15 = arith.constant 0 : index
    %c0_16 = arith.constant 0 : index
    %c0_17 = arith.constant 0 : index
    %33 = vector.load %arg9[%c0_15, %c0_16, %c0_17] : memref<1x1x15xf32, #tpu.memory_space<vmem>>, vector<1x1x15xf32>
    %34 = vector.shape_cast %33 : vector<1x1x15xf32> to vector<1x15xf32>
    %35 = vector.shape_cast %32 : vector<1x15xf32> to vector<1x1x15xf32>
    tpu.vector_store %arg9[%c0_15, %c0_16, %c0_17], %35 {strides = array<i32>} : memref<1x1x15xf32, #tpu.memory_space<vmem>>, vector<1x1x15xf32>,
    %c0_18 = arith.constant 0 : index
    %c0_19 = arith.constant 0 : index
    %36 = vector.load %arg5[%c0_18, %c0_19] : memref<15x32xf32, #tpu.memory_space<vmem>>, vector<15x32xf32>
    %cst_20 = arith.constant dense<0.000000e+00> : vector<1x32xf32>
    %37 = tpu.matmul %32, %36, %cst_20 {dimension_numbers = #tpu.dot_dimension_numbers<[1], [0], [0], [1], [0, 0, 1, 1], [], []>} : vector<1x15xf32>, vector<15x32xf32>, vector<1x32xf32> -> vector<1x32xf32>
    %c64 = arith.constant 64 : index
    %c0_21 = arith.constant 0 : index
    %38 = vector.load %arg7[%c64, %c0_21] : memref<232x128xf32, #tpu.memory_space<vmem>>, vector<32x32xf32>
    %cst_22 = arith.constant dense<0.000000e+00> : vector<1x32xf32>
    %39 = tpu.matmul %7, %38, %cst_22 {dimension_numbers = #tpu.dot_dimension_numbers<[1], [0], [0], [1], [0, 0, 1, 1], [], []>} : vector<1x32xf32>, vector<32x32xf32>, vector<1x32xf32> -> vector<1x32xf32>
    %c96 = arith.constant 96 : index
    %c0_23 = arith.constant 0 : index
    %40 = vector.load %arg7[%c96, %c0_23] : memref<232x128xf32, #tpu.memory_space<vmem>>, vector<32x32xf32>
    %cst_24 = arith.constant dense<0.000000e+00> : vector<1x32xf32>
    %41 = tpu.matmul %37, %40, %cst_24 {dimension_numbers = #tpu.dot_dimension_numbers<[1], [0], [0], [1], [0, 0, 1, 1], [], []>} : vector<1x32xf32>, vector<32x32xf32>, vector<1x32xf32> -> vector<1x32xf32>
    %42 = arith.addf %39, %41 : vector<1x32xf32>
    %43 = arith.addf %42, %12 : vector<1x32xf32>
    %cst_25 = arith.constant 0.000000e+00 : f32
    %44 = vector.broadcast %cst_25 : f32 to vector<1x32xf32>
    %45 = arith.maximumf %43, %44 : vector<1x32xf32>
    %c128 = arith.constant 128 : index
    %c0_26 = arith.constant 0 : index
    %46 = vector.load %arg7[%c128, %c0_26] : memref<232x128xf32, #tpu.memory_space<vmem>>, vector<32x128xf32>
    %cst_27 = arith.constant dense<0.000000e+00> : vector<1x128xf32>
    %47 = tpu.matmul %45, %46, %cst_27 {dimension_numbers = #tpu.dot_dimension_numbers<[1], [0], [0], [1], [0, 0, 1, 1], [], []>} : vector<1x32xf32>, vector<32x128xf32>, vector<1x128xf32> -> vector<1x128xf32>
    %48 = arith.addf %47, %13 : vector<1x128xf32>
    %c160 = arith.constant 160 : index
    %c0_28 = arith.constant 0 : index
    %49 = vector.load %arg7[%c160, %c0_28] : memref<232x128xf32, #tpu.memory_space<vmem>>, vector<32x128xf32>
    %cst_29 = arith.constant dense<0.000000e+00> : vector<1x128xf32>
    %50 = tpu.matmul %8, %49, %cst_29 {dimension_numbers = #tpu.dot_dimension_numbers<[1], [0], [0], [1], [0, 0, 1, 1], [], []>} : vector<1x32xf32>, vector<32x128xf32>, vector<1x128xf32> -> vector<1x128xf32>
    %51 = arith.addf %48, %50 : vector<1x128xf32>
    %52 = arith.addf %51, %14 : vector<1x128xf32>
    %53 = vector.extract_strided_slice %52 {offsets = [0, 0], sizes = [1, 32], strides = [1, 1]} : vector<1x128xf32> to vector<1x32xf32>
    %54 = arith.negf %53 : vector<1x32xf32>
    %55 = math.exp %54 : vector<1x32xf32>
    %cst_30 = arith.constant 1.000000e+00 : f32
    %56 = vector.broadcast %cst_30 : f32 to vector<1x32xf32>
    %57 = arith.addf %56, %55 : vector<1x32xf32>
    %58 = arith.divf %56, %57 : vector<1x32xf32>
    %59 = vector.extract_strided_slice %52 {offsets = [0, 32], sizes = [1, 32], strides = [1, 1]} : vector<1x128xf32> to vector<1x32xf32>
    %60 = arith.negf %59 : vector<1x32xf32>
    %61 = math.exp %60 : vector<1x32xf32>
    %cst_31 = arith.constant 1.000000e+00 : f32
    %62 = vector.broadcast %cst_31 : f32 to vector<1x32xf32>
    %63 = arith.addf %62, %61 : vector<1x32xf32>
    %64 = arith.divf %62, %63 : vector<1x32xf32>
    %65 = vector.extract_strided_slice %52 {offsets = [0, 64], sizes = [1, 32], strides = [1, 1]} : vector<1x128xf32> to vector<1x32xf32>
    %66 = math.tanh %65 : vector<1x32xf32>
    %67 = vector.extract_strided_slice %52 {offsets = [0, 96], sizes = [1, 32], strides = [1, 1]} : vector<1x128xf32> to vector<1x32xf32>
    %68 = arith.negf %67 : vector<1x32xf32>
    %69 = math.exp %68 : vector<1x32xf32>
    %cst_32 = arith.constant 1.000000e+00 : f32
    %70 = vector.broadcast %cst_32 : f32 to vector<1x32xf32>
    %71 = arith.addf %70, %69 : vector<1x32xf32>
    %72 = arith.divf %70, %71 : vector<1x32xf32>
    %73 = arith.mulf %64, %9 : vector<1x32xf32>
    %74 = arith.mulf %58, %66 : vector<1x32xf32>
    %75 = arith.addf %73, %74 : vector<1x32xf32>
    %76 = math.tanh %75 : vector<1x32xf32>
    %77 = arith.mulf %72, %76 : vector<1x32xf32>
    %c0_33 = arith.constant 0 : index
    %c0_34 = arith.constant 0 : index
    %78 = vector.load %arg12[%c0_33, %c0_34] : memref<1x32xf32, #tpu.memory_space<vmem>>, vector<1x32xf32>
    tpu.vector_store %arg12[%c0_33, %c0_34], %77 {strides = array<i32>} : memref<1x32xf32, #tpu.memory_space<vmem>>, vector<1x32xf32>,
    %c0_35 = arith.constant 0 : index
    %c0_36 = arith.constant 0 : index
    %79 = vector.load %arg13[%c0_35, %c0_36] : memref<1x32xf32, #tpu.memory_space<vmem>>, vector<1x32xf32>
    tpu.vector_store %arg13[%c0_35, %c0_36], %75 {strides = array<i32>} : memref<1x32xf32, #tpu.memory_space<vmem>>, vector<1x32xf32>,
    %c0_37 = arith.constant 0 : index
    %c0_38 = arith.constant 0 : index
    %c0_39 = arith.constant 0 : index
    %80 = vector.load %arg10[%c0_37, %c0_38, %c0_39] : memref<1x1x32xf32, #tpu.memory_space<vmem>>, vector<1x1x32xf32>
    %81 = vector.shape_cast %80 : vector<1x1x32xf32> to vector<1x32xf32>
    %82 = vector.shape_cast %77 : vector<1x32xf32> to vector<1x1x32xf32>
    tpu.vector_store %arg10[%c0_37, %c0_38, %c0_39], %82 {strides = array<i32>} : memref<1x1x32xf32, #tpu.memory_space<vmem>>, vector<1x1x32xf32>,
    %c0_40 = arith.constant 0 : index
    %c0_41 = arith.constant 0 : index
    %c0_42 = arith.constant 0 : index
    %83 = vector.load %arg11[%c0_40, %c0_41, %c0_42] : memref<1x1x32xf32, #tpu.memory_space<vmem>>, vector<1x1x32xf32>
    %84 = vector.shape_cast %83 : vector<1x1x32xf32> to vector<1x32xf32>
    %85 = vector.shape_cast %75 : vector<1x32xf32> to vector<1x1x32xf32>
    tpu.vector_store %arg11[%c0_40, %c0_41, %c0_42], %85 {strides = array<i32>} : memref<1x1x32xf32, #tpu.memory_space<vmem>>, vector<1x1x32xf32>,
    %c192 = arith.constant 192 : index
    %c0_43 = arith.constant 0 : index
    %86 = vector.load %arg7[%c192, %c0_43] : memref<232x128xf32, #tpu.memory_space<vmem>>, vector<32x40xf32>
    %cst_44 = arith.constant dense<0.000000e+00> : vector<1x40xf32>
    %87 = tpu.matmul %77, %86, %cst_44 {dimension_numbers = #tpu.dot_dimension_numbers<[1], [0], [0], [1], [0, 0, 1, 1], [], []>} : vector<1x32xf32>, vector<32x40xf32>, vector<1x40xf32> -> vector<1x40xf32>
    %88 = arith.addf %87, %15 : vector<1x40xf32>
    %cst_45 = arith.constant dense<0xFF800000> : vector<1xf32>
    %89 = vector.multi_reduction <maximumf>, %88, %cst_45 [1] : vector<1x40xf32> to vector<1xf32>
    %90 = vector.shape_cast %89 : vector<1xf32> to vector<1x1xf32>
    %91 = vector.broadcast %90 : vector<1x1xf32> to vector<1x40xf32>
    %92 = arith.subf %88, %91 : vector<1x40xf32>
    %93 = math.exp %92 : vector<1x40xf32>
    %cst_46 = arith.constant dense<0.000000e+00> : vector<1xf32>
    %94 = vector.multi_reduction <add>, %93, %cst_46 [1] : vector<1x40xf32> to vector<1xf32>
    %95 = vector.shape_cast %94 : vector<1xf32> to vector<1x1xf32>
    %96 = math.log %95 : vector<1x1xf32>
    %97 = vector.broadcast %96 : vector<1x1xf32> to vector<1x40xf32>
    %98 = arith.subf %92, %97 : vector<1x40xf32>
    %c0_47 = arith.constant 0 : index
    %c0_48 = arith.constant 0 : index
    %c0_49 = arith.constant 0 : index
    %99 = vector.load %arg8[%c0_47, %c0_48, %c0_49] : memref<1x1x40xf32, #tpu.memory_space<vmem>>, vector<1x1x40xf32>
    %100 = vector.shape_cast %99 : vector<1x1x40xf32> to vector<1x40xf32>
    %101 = vector.shape_cast %98 : vector<1x40xf32> to vector<1x1x40xf32>
    tpu.vector_store %arg8[%c0_47, %c0_48, %c0_49], %101 {strides = array<i32>} : memref<1x1x40xf32, #tpu.memory_space<vmem>>, vector<1x1x40xf32>,
    return
  }
  func.func @transform_0(%arg0: i32, %arg1: memref<6xi32, #tpu.memory_space<smem>>) -> (i32, i32, i32) {
    %c0_i32 = arith.constant 0 : i32
    %c0_i32_0 = arith.constant 0 : i32
    %c0_i32_1 = arith.constant 0 : i32
    %c0_i32_2 = arith.constant 0 : i32
    return %c0_i32, %c0_i32_0, %c0_i32_1 : i32, i32, i32
  }
  func.func @transform_1(%arg0: i32, %arg1: memref<6xi32, #tpu.memory_space<smem>>) -> (i32, i32) {
    %c0_i32 = arith.constant 0 : i32
    %c0_i32_0 = arith.constant 0 : i32
    %c0_i32_1 = arith.constant 0 : i32
    return %c0_i32, %c0_i32_0 : i32, i32
  }
  func.func @transform_2(%arg0: i32, %arg1: memref<6xi32, #tpu.memory_space<smem>>) -> (i32, i32) {
    %c0_i32 = arith.constant 0 : i32
    %c0_i32_0 = arith.constant 0 : i32
    %c0_i32_1 = arith.constant 0 : i32
    return %c0_i32, %c0_i32_0 : i32, i32
  }
  func.func @transform_3(%arg0: i32, %arg1: memref<6xi32, #tpu.memory_space<smem>>) -> (i32, i32) {
    %c0_i32 = arith.constant 0 : i32
    %c0_i32_0 = arith.constant 0 : i32
    %c0_i32_1 = arith.constant 0 : i32
    return %c0_i32, %c0_i32_0 : i32, i32
  }
  func.func @transform_4(%arg0: i32, %arg1: memref<6xi32, #tpu.memory_space<smem>>) -> (i32, i32) {
    %c0_i32 = arith.constant 0 : i32
    %c0_i32_0 = arith.constant 0 : i32
    %c0_i32_1 = arith.constant 0 : i32
    return %c0_i32, %c0_i32_0 : i32, i32
  }
  func.func @transform_5(%arg0: i32, %arg1: memref<6xi32, #tpu.memory_space<smem>>) -> (i32, i32) {
    %c0_i32 = arith.constant 0 : i32
    %c0_i32_0 = arith.constant 0 : i32
    %c0_i32_1 = arith.constant 0 : i32
    return %c0_i32, %c0_i32_0 : i32, i32
  }
  func.func @transform_6(%arg0: i32, %arg1: memref<6xi32, #tpu.memory_space<smem>>) -> (i32, i32, i32) {
    %c0_i32 = arith.constant 0 : i32
    %c0_i32_0 = arith.constant 0 : i32
    %c0_i32_1 = arith.constant 0 : i32
    return %arg0, %c0_i32, %c0_i32_0 : i32, i32, i32
  }
  func.func @transform_7(%arg0: i32, %arg1: memref<6xi32, #tpu.memory_space<smem>>) -> (i32, i32, i32) {
    %c0_i32 = arith.constant 0 : i32
    %c0_i32_0 = arith.constant 0 : i32
    %c0_i32_1 = arith.constant 0 : i32
    return %arg0, %c0_i32, %c0_i32_0 : i32, i32, i32
  }
  func.func @transform_8(%arg0: i32, %arg1: memref<6xi32, #tpu.memory_space<smem>>) -> (i32, i32, i32) {
    %c0_i32 = arith.constant 0 : i32
    %c0_i32_0 = arith.constant 0 : i32
    %c0_i32_1 = arith.constant 0 : i32
    return %arg0, %c0_i32, %c0_i32_0 : i32, i32, i32
  }
  func.func @transform_9(%arg0: i32, %arg1: memref<6xi32, #tpu.memory_space<smem>>) -> (i32, i32, i32) {
    %c0_i32 = arith.constant 0 : i32
    %c0_i32_0 = arith.constant 0 : i32
    %c0_i32_1 = arith.constant 0 : i32
    return %arg0, %c0_i32, %c0_i32_0 : i32, i32, i32
  }
}

</mosaic_0001>

<bundles_post_ra>
// kernel: attn_decoder_decode.1
= control target key start
LH: loop header
LB: loop body
LE: loop exit
PB: predicated region body
PF: predicated region fallthrough
CT: control target
= control target key end

     0   :  { %s939_s16 = smov [#allocation5]   ;;  %s1112_s0 = inlined_call_operand.vmem [shape: s32[6], index: 0, kind: input, shape index: {}]   ;;  %s1113_s1 = inlined_call_operand.vmem [shape: f32[40,1,32], index: 1, kind: input, shape index: {}]   ;;  %s1114_s2 = inlined_call_operand.vmem [shape: f32[1,32], index: 2, kind: input, shape index: {}]   ;;  %s1115_s3 = inlined_call_operand.vmem [shape: f32[1,32], index: 3, kind: input, shape index: {}]   ;;  %s1116_s4 = inlined_call_operand.vmem [shape: f32[15,32], index: 4, kind: input, shape index: {}]   ;;  %s1117_s5 = inlined_call_operand.vmem [shape: f32[1,15], index: 5, kind: input, shape index: {}]   ;;  %s1118_s6 = inlined_call_operand.hbm [shape: f32[232,128], index: 6, kind: input, shape index: {}]   ;;  %s1119_s7 = inlined_call_operand.vmem [shape: f32[6,1,40], index: 7, kind: output, shape index: {0}]   ;;  %s1120_s8 = inlined_call_operand.vmem [shape: f32[6,1,15], index: 8, kind: output, shape index: {1}]   ;;  %s1121_s9 = inlined_call_operand.vmem [shape: f32[6,1,32], index: 9, kind: output, shape index: {2}]   ;;  %s1122_s10 = inlined_call_operand.vmem [shape: f32[6,1,32], index: 10, kind: output, shape index: {3}]  }
   0x1   :  { %s17_s15 = sshll.u32 %s1112_s0, 4  ;;  %s18_s15 = int_to_ptr.vmem [resolvable:$true] %s17_s15 }
   0x2   :  { %20 = dma.vmem_to_smem %s18_s15, 16, %s939_s16, [#allocation4] }
   0x3   :  { %929 = dma.done.wait [#allocation4], 16 }
   0x4   :  { %930 = vsyncadd [#allocation4], 4294967280 }
   0x5   :  { %23 = sfence }
   0x6   :  { %24 = vsyncpa [#allocation7], 0  ;;  %s1004_s17 = smov 0  }
   0x7 LB: > { %s291_s0 = sshll.u32 %s1118_s6, 4  ;;  %s1013_s20 = sadd.s32 4294967295, %s937_s17   ;;  %s937_s17 = sphi %s1004_s17, %s30_s17   ;;  %s292_s0 = int_to_ptr.hbm [resolvable:$true] %s291_s0 }
   0x8   : > { %p824_p0 = scmp.ge.s32.totalorder %s937_s17, 1  ;;  %p265_p1 = scmp.lt.s32.totalorder %s937_s17, 7 }
   0x9   : > { %p825_p2 = scmp.ne.s32.totalorder %s1013_s20, 0  ;;  %p849_p3 = scmp.eq.s32.totalorder %s1013_s20, 0 }
   0xa   : > { %p266_p4 = pnand %p824_p0, %p265_p1  ;;  %s940_s21 = smov [#allocation6]  }
   0xb   : > { %s293_s22 = sshll.u32 %s940_s21, 4  ;;  %s941_s23 = smov 128   ;;  %s294_s22 = int_to_ptr.vmem [resolvable:$true] %s293_s22 }
   0xc   : > { %p845_p5 = pneg %p266_p4  ;;  %s942_s24 = smov 8  }
   0xd   : > { %309 = sbr.rel (%p266_p4) target bundleno = 1658 (0x67a), region = 44 }
   0xe   : > { %p846_p6 = pnand %p849_p3, %p845_p5 }
  0x10   : > { %848 = dma.hbm_to_vmem [thread:$0]  (!%p846_p6), %s292_s0, 3712, %s294_s22, [#allocation7], %s941_s23, %s941_s23, %s942_s24  }
  0x12   : > { %932 = dma.done.wait (%p849_p3), [#allocation7], 3712  }
  0x13   : > { %934 = vsyncadd (%p849_p3), [#allocation7], 4294963584  ;;  %p348_p7 = scmp.lt.s32.totalorder %s1013_s20, 5 }
  0x14   : > { %363 = sbr.rel (%p825_p2) target bundleno = 28 (0x1c), region = 52 }
  0x15   : > { %s1021_s25 = scalar_select %p348_p7, %s1013_s20, 5 }
  0x17   : > { %s350_s28 = scalar_lea.vmem %s1119_s7, %s1021_s25  ;;  %s353_s11 = scalar_lea.vmem %s1120_s8, %s1021_s25 }
  0x18   : > { %s356_s14 = scalar_lea.vmem %s1121_s9, %s1021_s25  ;;  %s359_s18 = scalar_lea.vmem %s1122_s10, %s1021_s25 }
  0x19   : > { %v364_v0 = vld [vmem:[%s1114_s2] sm:$0x1]  ;;  %vm365_vm0 = vcmask 253952  }
  0x1a   : > { %v367_v1 = vld [vmem:[%s1115_s3] sm:$0x1]  ;;  %366 = vst.msk [vmem:[#allocation2] sm:$0x1] %vm365_vm0, %v364_v0 }
  0x1b   : > { %368 = vst.msk [vmem:[#allocation3] sm:$0x1] %vm365_vm0, %v367_v1 }
  0x1c PF: > { %v382_v2 = vld [vmem:[#allocation6 + $0x38] sm:$0xff]  ;;  %v381_v4 = vld [vmem:[#allocation6 + $0x30] sm:$0xff]  ;;  %s369_s23 = sld [smem:[#allocation5 + %s1013_s20]]  ;;  %v380_v6 = vld [vmem:[#allocation6 + $0x28] sm:$0xff]  ;;  %vm383_vm1 = vcmask 261120   ;;  %vm433_vm2 = vcmask 114688  }
  0x1d   : > { %v378_v3 = vld [vmem:[#allocation6 + $0x18] sm:$0xff]  ;;  %399 = vmatpush.msra.mxu0 %v382_v2  ;;  %v377_v5 = vld [vmem:[#allocation6 + $0x10] sm:$0xff]  ;;  %v376_v7 = vld [vmem:[#allocation6 + $0x8] sm:$0xff]  ;;  %vm465_vm3 = vcmask 1046528   ;;  %vm461_vm8 = vcmask 121856   ;;  %s944_s0 = smov 32  }
  0x1e   : > { %422 = vmatpush.msra.mxu1 %v378_v3  ;;  %v379_v8 = vld [vmem:[#allocation6 + $0x20] sm:$0xff]  ;;  %v431_v16 = vld [vmem:[%s1117_s5] sm:$0x1]  ;;  %v491_v29 = vld [vmem:[#allocation6 + $0x50] sm:$0xff]  ;;  %s945_s21 = smov 96   ;;  %vm648_vm13 = vcmask 253952  }
  0x1f   : > { %400 = vmatpush.msra.mxu0 %v381_v4  ;;  %v375_v9 = vld [vmem:[#allocation6] sm:$0xff]  ;;  %v492_v27 = vld [vmem:[#allocation6 + $0x58] sm:$0xff]  ;;  %v495_v30 = vld [vmem:[#allocation6 + $0x70] sm:$0xff]  ;;  %vm685_vm14 = vcmask 319488  }
  0x20   : > { %423 = vmatpush.msra.mxu1 %v377_v5  ;;  %v1056_v13 = vld [vmem:[#allocation6 + $0xe0] sm:$0xff]  ;;  %v496_v28 = vld [vmem:[#allocation6 + $0x78] sm:$0xff]  ;;  %v490_v31 = vld [vmem:[#allocation6 + $0x48] sm:$0xff] }
  0x21   : > { %401 = vmatpush.msra.mxu0 %v380_v6  ;;  %v1048_v10 = vld [vmem:[#allocation2] sm:$0x1]  ;;  %v460_v25 = vld [vmem:[%s1116_s4 + $0x8] sm:$0x7f]  ;;  %512 = vmatpush.msra.mxu3 %v496_v28  ;;  %v547_v49 = vld [vmem:[#allocation6 + $0x90] sm:$0xff]  ;;  %v541_v57 = vrot.slane %v1056_v13, 1 }
  0x22   : > { %424 = vmatpush.msra.mxu1 %v376_v7  ;;  %s370_s27 = scalar_lea.vmem %s1113_s1, %s369_s23  ;;  %v459_v26 = vld [vmem:[%s1116_s4] sm:$0xff]  ;;  %831 = vmatpush.msk.msra.mxu2 %vm465_vm3, %v460_v25  ;;  %v494_v32 = vld [vmem:[#allocation6 + $0x68] sm:$0xff]  ;;  %v576_v52 = vld [vmem:[#allocation6 + $0xb0] sm:$0xff]  ;;  %v549_v62 = vrot.slane %v1056_v13, 2  ;;  %v599_v2 = vrot.slane %v1056_v13, 3 }
  0x23   : > { %402 = vmatpush.msra.mxu0 %v379_v8  ;;  %v371_v11 = vld [vmem:[%s370_s27] sm:$0x1]  ;;  %513 = vmatpush.msra.mxu3 %v495_v30  ;;  %v489_v33 = vld [vmem:[#allocation6 + $0x40] sm:$0xff]  ;;  %v546_v51 = vld [vmem:[#allocation6 + $0x88] sm:$0xff] }
  0x24   : > { %425 = vmatpush.msra.mxu1 %v375_v9  ;;  %829 = vmatmul.msk.f32.vlgmr.msra.gmra.mxu0 %vm383_vm1, %v1048_v10  ;;  %v493_v46 = vld [vmem:[#allocation6 + $0x60] sm:$0xff]  ;;  %v548_v47 = vld [vmem:[#allocation6 + $0x98] sm:$0xff]  ;;  %v575_v54 = vld [vmem:[#allocation6 + $0xa8] sm:$0xff] }
  0x25   : > { %830 = vmatmul.msk.f32.vlgmr.msra.gmra.mxu1 %vm383_vm1, %v371_v11  ;;  %484 = vmatpush.msra.mxu2 %v459_v26  ;;  %v577_v50 = vld [vmem:[#allocation6 + $0xb8] sm:$0xff]  ;;  %v545_v53 = vld [vmem:[#allocation6 + $0x80] sm:$0xff]  ;;  %v658_v30 = vld [vmem:[#allocation6 + $0xc8] sm:$0xff] }
  0x26   : > { %514 = vmatpush.msra.mxu3 %v494_v32  ;;  %566 = vmatpush.msrb.mxu0 %v548_v47  ;;  %v574_v55 = vld [vmem:[#allocation6 + $0xa0] sm:$0xff]  ;;  %v866_v6 = vld [vmem:[#allocation3] ss:$0 sm:$0xff] }
  0x27   : > { %532 = vmatpush.msrb.mxu2 %v492_v27  ;;  %590 = vmatpush.msrb.mxu1 %v577_v50  ;;  %v660_v28 = vld [vmem:[#allocation6 + $0xd8] sm:$0xff] }
  0x28   : > { %515 = vmatpush.msra.mxu3 %v493_v46  ;;  %567 = vmatpush.msrb.mxu0 %v547_v49 }
  0x29   : > { %533 = vmatpush.msrb.mxu2 %v491_v29  ;;  %591 = vmatpush.msrb.mxu1 %v576_v52  ;;  %v659_v29 = vld [vmem:[#allocation6 + $0xd0] sm:$0xff] }
  0x2a   : > { %568 = vmatpush.msrb.mxu0 %v546_v51  ;;  %677 = vmatpush.msrb.mxu3 %v660_v28 }
  0x2b   : > { %534 = vmatpush.msrb.mxu2 %v490_v31  ;;  %592 = vmatpush.msrb.mxu1 %v575_v54  ;;  %v657_v31 = vld [vmem:[#allocation6 + $0xc0] sm:$0xff] }
  0x2c   : > { %569 = vmatpush.msrb.mxu0 %v545_v53  ;;  %678 = vmatpush.msrb.mxu3 %v659_v29 }
  0x2d   : > { %535 = vmatpush.msrb.mxu2 %v489_v33  ;;  %593 = vmatpush.msrb.mxu1 %v574_v55 }
  0x2e   : > { %836 = vmatmul.msk.f32.vlgmr.msrb.gmra.mxu1 %vm383_vm1, %v1048_v10  ;;  %679 = vmatpush.msrb.mxu3 %v658_v30 }
  0x30   : > { %680 = vmatpush.msrb.mxu3 %v657_v31 }
  0xa1   : > { %v404_v12 = vpop.f32.mrf.mxu0 }
  0xa2   : > { %v427_v14 = vpop.f32.mrf.mxu1 }
  0xa3   : > { %v428_v15 = vadd.f32 %v427_v14, %v404_v12 }
  0xa5   : > { %v430_v17 = vadd.f32 %v428_v15, %v1056_v13 }
  0xa7   : > { %v432_v18 = vadd.f32 %v431_v16, %v430_v17 }
  0xa9   : > { %v434_v19 = vsel %vm433_vm2, %v432_v18, -inf }
  0xaa   : > { %435 = vmax.xlane.f32.xlu0 %v434_v19 }
  0xab   : > { %v595_v0 = vpop.f32.mrf.mxu1 }
 0x11d   : > { %v436_v20 = vpop.xlane.xlu0 %435 }
 0x11e   : > { %v437_v21 = vsub.f32 %v432_v18, %v436_v20 }
 0x120   : > { %v438_v22 = vmul.f32 1.442695, %v437_v21 }
 0x122   : > { %867 = vpow2.f32 %v438_v22 }
 0x128   : > { %v868_v23 = vpop.eup %867 }
 0x129   : > { %v440_v24 = vsel %vm433_vm2, %v868_v23, 0.0 }
 0x12a   : > { %441 = vadd.xlane.f32.xlu0 %v440_v24 }
 0x19d   : > { %v442_v34 = vpop.xlane.xlu0 %441 }
 0x19e   : > { %869 = vrcp.f32 %v442_v34  ;;  %v454_v38 = vand.u32 2147483648, %v442_v34  ;;  %v452_v40 = vand.u32 2147483647, %v442_v34  ;;  %vm448_vm5 = vweird.f32 %v442_v34 }
 0x1a0   : > { %v455_v42 = vor.u32 1.1754944e-38, %v454_v38  ;;  %vm453_vm7 = vcmp.eq.f32.partialorder %v452_v40, 8.507059e+37 }
 0x1a4   : > { %v870_v35 = vpop.eup %869 }
 0x1a5   : > { %v444_v36 = vmul.f32 %v870_v35, %v442_v34  ;;  %vm449_vm4 = vweird.f32 %v870_v35 }
 0x1a6   : > { %vm450_vm6 = vmor %vm448_vm5, %vm449_vm4 }
 0x1a7   : > { %v445_v37 = vsub.f32 1.0, %v444_v36  ;;  %v661_v36 = vrot.slane %v1056_v13, 4 }
 0x1a9   : > { %v446_v39 = vmul.f32 %v870_v35, %v445_v37 }
 0x1ab   : > { %v447_v41 = vadd.f32 %v870_v35, %v446_v39 }
 0x1ad   : > { %v451_v43 = vsel %vm450_vm6, %v870_v35, %v447_v41 }
 0x1ae   : > { %v456_v44 = vsel %vm453_vm7, %v455_v42, %v451_v43 }
 0x1af   : > { %v457_v45 = vmul.f32 %v868_v23, %v456_v44 }
 0x1b1   : > { %458 = vst.msk [vmem:[%s353_s11] sm:$0x1] %vm433_vm2, %v457_v45  ;;  %832 = vmatmul.msk.f32.vlgmr.msra.gmra.mxu2 %vm461_vm8, %v457_v45  ;;  %s943_s11 = smov 64  }
 0x1b9   : > { %834 = vmatmul.msk.f32.vlgmr.msrb.gmra.mxu2 %vm383_vm1, %v371_v11 }
 0x234   : > { %v486_v48 = vpop.f32.mrf.mxu2 }
 0x235   : > { %833 = vmatmul.msk.f32.vlgmr.msra.gmra.mxu3 %vm383_vm1, %v486_v48 }
 0x23c   : > { %v537_v56 = vpop.f32.mrf.mxu2 }
 0x2b8   : > { %v517_v58 = vpop.f32.mrf.mxu3 }
 0x2b9   : > { %v538_v59 = vadd.f32 %v537_v56, %v517_v58 }
 0x2bb   : > { %v543_v60 = vadd.f32 %v541_v57, %v538_v59 }
 0x2bd   : > { %v544_v61 = vmax.f32 %v543_v60, 0.0 }
 0x2bf   : > { %835 = vmatmul.msk.f32.vlgmr.msrb.gmra.mxu0 %vm383_vm1, %v544_v61 }
 0x33c   : > { %v571_v63 = vpop.f32.mrf.mxu0 }
 0x33d   : > { %v572_v1 = vadd.f32 %v571_v63, %v549_v62 }
 0x33f   : > { %v598_v3 = vadd.f32 %v595_v0, %v572_v1 }
 0x341   : > { %v601_v4 = vadd.f32 %v599_v2, %v598_v3 }
 0x343   : > { %871 = vtanh.f32 %v601_v4  ;;  %v837_v7 = vmul.f32 -1.442695, %v601_v4 }
 0x345   : > { %873 = vpow2.f32 %v837_v7 }
 0x349   : > { %v872_v5 = vpop.eup %871 }
 0x34a   : > { %629 = vrot.lane.b32.xlu1 %v872_v5, %s943_s11 }
 0x34b   : > { %v874_v8 = vpop.eup %873 }
 0x34c   : > { %v605_v9 = vadd.f32 1.0, %v874_v8 }
 0x34e   : > { %875 = vrcp.f32 %v605_v9  ;;  %v617_v16 = vand.u32 2147483648, %v605_v9  ;;  %vm611_vm10 = vweird.f32 %v605_v9  ;;  %v615_v17 = vand.u32 2147483647, %v605_v9 }
 0x350   : > { %v618_v19 = vor.u32 1.1754944e-38, %v617_v16  ;;  %vm616_vm12 = vcmp.eq.f32.partialorder %v615_v17, 8.507059e+37 }
 0x352   : > { %624 = vrot.lane.b32.xlu1 %v866_v6, %s944_s0 }
 0x354   : > { %v876_v10 = vpop.eup %875 }
 0x355   : > { %v607_v11 = vmul.f32 %v876_v10, %v605_v9  ;;  %vm612_vm9 = vweird.f32 %v876_v10 }
 0x356   : > { %vm613_vm11 = vmor %vm611_vm10, %vm612_vm9 }
 0x357   : > { %v608_v12 = vsub.f32 1.0, %v607_v11 }
 0x359   : > { %v609_v14 = vmul.f32 %v876_v10, %v608_v12 }
 0x35b   : > { %v610_v15 = vadd.f32 %v876_v10, %v609_v14 }
 0x35d   : > { %v614_v18 = vsel %vm613_vm11, %v876_v10, %v610_v15 }
 0x35e   : > { %v619_v21 = vsel %vm616_vm12, %v618_v19, %v614_v18 }
 0x3bc   : > { %v630_v20 = vpop.permute.xlu1 %629 }
 0x3bd   : > { %v632_v22 = vmul.f32 %v630_v20, %v619_v21 }
 0x3bf   : > { %634 = vrot.lane.b32.xlu2 %v632_v22, %s944_s0 }
 0x3c4   : > { %v625_v23 = vpop.permute.xlu1 %624 }
 0x3c5   : > { %v627_v24 = vmul.f32 %v625_v23, %v619_v21 }
 0x419   : > { %v635_v25 = vpop.permute.xlu2 %634 }
 0x41a   : > { %v637_v26 = vadd.f32 %v635_v25, %v627_v24 }
 0x41c   : > { %877 = vtanh.f32 %v637_v26 }
 0x422   : > { %v878_v27 = vpop.eup %877 }
 0x423   : > { %640 = vrot.lane.b32.xlu2 %v878_v27, %s943_s11 }
 0x47d   : > { %v641_v32 = vpop.permute.xlu2 %640 }
 0x47e   : > { %v643_v33 = vmul.f32 %v641_v32, %v619_v21 }
 0x480   : > { %645 = vrot.lane.b32.xlu0 %v643_v33, %s944_s0 }
 0x488   : > { %651 = vrot.lane.b32.xlu0 %v637_v26, %s945_s21 }
 0x4f2   : > { %v646_v34 = vpop.permute.xlu0 %645 }
 0x4f3   : > { %649 = vst.msk [vmem:[#allocation2] sm:$0x1] %vm648_vm13, %v646_v34  ;;  %838 = vmatmul.msk.f32.vlgmr.msrb.gmra.mxu3 %vm383_vm1, %v646_v34 }
 0x4f4   : > { %655 = vst.msk [vmem:[%s356_s14] sm:$0x1] %vm648_vm13, %v646_v34 }
 0x4fa   : > { %v652_v35 = vpop.permute.xlu0 %651 }
 0x4fb   : > { %654 = vst.msk [vmem:[#allocation3] sm:$0x1] %vm648_vm13, %v652_v35 }
 0x4fc   : > { %656 = vst.msk [vmem:[%s359_s18] sm:$0x1] %vm648_vm13, %v652_v35 }
 0x576   : > { %v682_v37 = vpop.f32.mrf.mxu3 }
 0x577   : > { %v683_v38 = vadd.f32 %v682_v37, %v661_v36 }
 0x579   : > { %v686_v39 = vsel %vm685_vm14, %v683_v38, -inf }
 0x57a   : > { %687 = vmax.xlane.f32.xlu1 %v686_v39 }
 0x5ed   : > { %v688_v40 = vpop.xlane.xlu1 %687 }
 0x5ee   : > { %v689_v41 = vsub.f32 %v683_v38, %v688_v40 }
 0x5f0   : > { %v690_v42 = vmul.f32 1.442695, %v689_v41 }
 0x5f2   : > { %879 = vpow2.f32 %v690_v42 }
 0x5f8   : > { %v880_v43 = vpop.eup %879 }
 0x5f9   : > { %v692_v44 = vsel %vm685_vm14, %v880_v43, 0.0 }
 0x5fa   : > { %693 = vadd.xlane.f32.xlu2 %v692_v44 }
 0x66d   : > { %v694_v45 = vpop.xlane.xlu2 %693 }
 0x66e   : > { %881 = vlog2.f32 %v694_v45 }
 0x674   : > { %v882_v46 = vpop.eup %881 }
 0x675   : > { %v696_v47 = vmul.f32 0.6931472, %v882_v46 }
 0x677   : > { %v697_v13 = vsub.f32 %v689_v41, %v696_v47 }
 0x679   : > { %698 = vst.msk [vmem:[%s350_s28] sm:$0x1] %vm685_vm14, %v697_v13 }
 0x67a PF: > { %s30_s17 = sadd.s32 1, %s937_s17  }
 0x67b   : > { %p27_p8 = scmp.ge.s32.totalorder %s30_s17, 8  }
 0x67d   :  { %29 = sbr.rel (!%p27_p8) target bundleno = 7 (0x7), region = 117 }
 0x682   :  { %752 = vsyncpa [#allocation7], 1 }
 0x683   :  { %754 = vsyncpa [#allocation7 + $0x1], 1 }

</bundles_post_ra>
